<compile_context>
chip_gen: v7x
topology: tpu7x:2x2x1
jax: 0.10.0
libtpu: 0.0.40
codegen_flags: <defaults>
</compile_context>

<pallas_src>
import jax
import jax.numpy as jnp
from jax.experimental import pallas as pl
from jax.experimental.pallas import tpu as pltpu

IN_FEATURES = 784
HIDDEN = 50
CLASSES = 10
HP = 64                  # hidden width padded to a lane-friendly size
CP = 64                  # class width padded so the packed slab is 4*64 lanes
SLAB = 3 * HP + CP       # 256 lanes -> fully lane-dense output store


def _round_up(n, m):
    return (n + m - 1) // m * m


def _pad2(a, rows, cols):
    return jnp.pad(a, ((0, rows - a.shape[0]), (0, cols - a.shape[1])))


def mynet_kernel(x_ref, w1_ref, b1_ref, w2_ref, b2_ref, w3_ref, b3_ref,
                 w4_ref, b4_ref, slab_ref):
    x = x_ref[...]                                                  # (TB, 784)

    # fc1..fc3 + relu (zero-padded lanes stay exactly zero: relu(0 + 0) = 0)
    a1 = jnp.maximum(
        jnp.dot(x, w1_ref[...], preferred_element_type=jnp.float32)
        + b1_ref[...], 0.0)
    a2 = jnp.maximum(
        jnp.dot(a1, w2_ref[...], preferred_element_type=jnp.float32)
        + b2_ref[...], 0.0)
    a3 = jnp.maximum(
        jnp.dot(a2, w3_ref[...], preferred_element_type=jnp.float32)
        + b3_ref[...], 0.0)
    logits = (jnp.dot(a3, w4_ref[...], preferred_element_type=jnp.float32)
              + b4_ref[...])                                        # (TB, CP)

    # log_softmax over ONLY the 10 real class lanes (pad lanes masked to -inf).
    lane = jax.lax.broadcasted_iota(jnp.int32, logits.shape, 1)
    valid = lane < CLASSES
    masked = jnp.where(valid, logits, -jnp.inf)
    m = jnp.max(masked, axis=-1, keepdims=True)
    shifted = masked - m
    lse = jnp.log(jnp.sum(jnp.exp(shifted), axis=-1, keepdims=True))
    logp = jnp.where(valid, shifted - lse, 0.0)

    # One lane-dense (TB, 256) store instead of four masked sub-128-lane stores.
    slab_ref[...] = jnp.concatenate(
        [jnp.sqrt(a1), jnp.sqrt(a2), jnp.sqrt(a3), logp], axis=-1)


def mynet_forward(x_nchw, params, *, tb=2048, use_bf16_inputs=False):
    """x_nchw: (B, 1, 28, 28) f32.  params: w1..w4 stored (in, out), b1..b4.

    tb: batch tile.  2048 fits comfortably in v7x's 64 MiB VMEM (and v5e's
    lower roofline); on v6e (128 MiB VMEM) tb=4096-8192 amortizes the per-step
    grid overhead a little further.
    """
    B = x_nchw.shape[0]
    x = x_nchw.reshape(B, IN_FEATURES)             # == torch x.view(-1, 784)

    # Batch tile: multiple of 8 sublanes; pad B up to a whole number of tiles.
    TB = min(_round_up(tb, 8), _round_up(B, 8))
    Bp = _round_up(B, TB)
    if Bp != B:
        x = jnp.pad(x, ((0, Bp - B), (0, 0)))

    # Zero-pad weights/biases to lane-friendly widths (tiny, VMEM-resident).
    w1 = _pad2(params["w1"], IN_FEATURES, HP)
    w2 = _pad2(params["w2"], HP, HP)
    w3 = _pad2(params["w3"], HP, HP)
    w4 = _pad2(params["w4"], HP, CP)
    b1 = _pad2(params["b1"].reshape(1, -1), 1, HP)
    b2 = _pad2(params["b2"].reshape(1, -1), 1, HP)
    b3 = _pad2(params["b3"].reshape(1, -1), 1, HP)
    b4 = _pad2(params["b4"].reshape(1, -1), 1, CP)

    if use_bf16_inputs:
        # Halves the dominant HBM stream (x); matmul still accumulates in f32.
        x = x.astype(jnp.bfloat16)
        w1 = w1.astype(jnp.bfloat16)

    grid = (Bp // TB,)
    resident = lambda shape: pl.BlockSpec(shape, lambda i: (0, 0))

    in_specs = [
        pl.BlockSpec((TB, IN_FEATURES), lambda i: (i, 0)),   # x: streamed
        resident((IN_FEATURES, HP)), resident((1, HP)),      # w1, b1: resident
        resident((HP, HP)), resident((1, HP)),               # w2, b2
        resident((HP, HP)), resident((1, HP)),               # w3, b3
        resident((HP, CP)), resident((1, CP)),               # w4, b4
    ]
    out_spec = pl.BlockSpec((TB, SLAB), lambda i: (i, 0))

    weight_bytes = sum(int(a.size) * a.dtype.itemsize
                       for a in (w1, w2, w3, w4, b1, b2, b3, b4))
    cost = pl.CostEstimate(
        flops=2 * Bp * (IN_FEATURES * HIDDEN + 2 * HIDDEN * HIDDEN
                        + HIDDEN * CLASSES),
        transcendentals=Bp * (CLASSES + 1),
        bytes_accessed=(Bp * IN_FEATURES * x.dtype.itemsize
                        + Bp * SLAB * 4 + weight_bytes),
    )

    # Double-buffered x tile + slab tile + resident weights, with headroom.
    vmem_limit = int(min(max(3 * TB * (IN_FEATURES + SLAB) * 4, 32 << 20),
                         100 << 20))

    slab = pl.pallas_call(
        mynet_kernel,
        out_shape=jax.ShapeDtypeStruct((Bp, SLAB), jnp.float32),
        grid=grid,
        in_specs=in_specs,
        out_specs=out_spec,
        compiler_params=pltpu.CompilerParams(
            dimension_semantics=("parallel",),
            vmem_limit_bytes=vmem_limit),
        cost_estimate=cost,
    )(x, w1, b1, w2, b2, w3, b3, w4, b4)

    a1 = slab[:B, 0:HIDDEN]
    a2 = slab[:B, HP:HP + HIDDEN]
    a3 = slab[:B, 2 * HP:2 * HP + HIDDEN]
    logp = slab[:B, 3 * HP:3 * HP + CLASSES]
    return a1, a2, a3, logp


def mynet_reference(x_nchw, params):
    """Pure-JAX reference identical to the PyTorch forward (dropout p=0)."""
    x = x_nchw.reshape(x_nchw.shape[0], IN_FEATURES)
    a1 = jnp.maximum(x @ params["w1"] + params["b1"], 0.0)
    a2 = jnp.maximum(a1 @ params["w2"] + params["b2"], 0.0)
    a3 = jnp.maximum(a2 @ params["w3"] + params["b3"], 0.0)
    logits = a3 @ params["w4"] + params["b4"]
    return (jnp.sqrt(a1), jnp.sqrt(a2), jnp.sqrt(a3),
            jax.nn.log_softmax(logits, axis=1))


def init_params(key):
    """Deterministic init mimicking nn.Linear (uniform(-1/sqrt(fan_in), +))."""
    dims = [(IN_FEATURES, HIDDEN), (HIDDEN, HIDDEN), (HIDDEN, HIDDEN),
            (HIDDEN, CLASSES)]
    params = {}
    for i, (fan_in, fan_out) in enumerate(dims, start=1):
        key, kw, kb = jax.random.split(key, 3)
        bound = 1.0 / (fan_in ** 0.5)
        # stored as (in, out) so the kernel computes x @ W + b
        params[f"w{i}"] = jax.random.uniform(
            kw, (fan_in, fan_out), jnp.float32, -bound, bound)
        params[f"b{i}"] = jax.random.uniform(
            kb, (fan_out,), jnp.float32, -bound, bound)
    return params


if __name__ == "__main__":
    key = jax.random.PRNGKey(0)
    kx, kp = jax.random.split(key)

    B = 2
    x = jax.random.uniform(kx, (B, 1, 28, 28), jnp.float32)   # MNIST-like NCHW
    params = init_params(kp)

    fwd = jax.jit(mynet_forward)
    a1, a2, a3, logp = jax.block_until_ready(fwd(x, params))

    # sanity: shapes, prob-space row sums, and match vs. pure-JAX reference
    assert a1.shape == (B, HIDDEN) and a2.shape == (B, HIDDEN)
    assert a3.shape == (B, HIDDEN) and logp.shape == (B, CLASSES)
    assert bool(jnp.all(jnp.abs(jnp.sum(jnp.exp(logp), axis=1) - 1.0) < 1e-5))

    r1, r2, r3, rlogp = mynet_reference(x, params)
    for got, ref in ((a1, r1), (a2, r2), (a3, r3), (logp, rlogp)):
        assert bool(jnp.allclose(got, ref, atol=1e-5, rtol=1e-5))

    print("KERNEL_OK")
</pallas_src>

<mosaic_0001>
module attributes {stable_mosaic.version = 11 : i64} {
  func.func @mynet_kernel(%arg0: i32, %arg1: memref<8x784xf32, #tpu.memory_space<vmem>>, %arg2: memref<784x64xf32, #tpu.memory_space<vmem>>, %arg3: memref<1x64xf32, #tpu.memory_space<vmem>>, %arg4: memref<64x64xf32, #tpu.memory_space<vmem>>, %arg5: memref<1x64xf32, #tpu.memory_space<vmem>>, %arg6: memref<64x64xf32, #tpu.memory_space<vmem>>, %arg7: memref<1x64xf32, #tpu.memory_space<vmem>>, %arg8: memref<64x64xf32, #tpu.memory_space<vmem>>, %arg9: memref<1x64xf32, #tpu.memory_space<vmem>>, %arg10: memref<8x256xf32, #tpu.memory_space<vmem>>) attributes {dimension_semantics = [#tpu.dimension_semantics<parallel>], iteration_bounds = array<i64: 1>, scalar_prefetch = 0 : i64, scratch_operands = 0 : i64, tpu.core_type = #tpu.core_type<tc>, window_params = [{transform_indices = @transform_0, window_bounds = array<i64: 8, 784>}, {pipeline_mode = #tpu.pipeline_mode<synchronous>, transform_indices = @transform_1, window_bounds = array<i64: 784, 64>}, {pipeline_mode = #tpu.pipeline_mode<synchronous>, transform_indices = @transform_2, window_bounds = array<i64: 1, 64>}, {pipeline_mode = #tpu.pipeline_mode<synchronous>, transform_indices = @transform_3, window_bounds = array<i64: 64, 64>}, {pipeline_mode = #tpu.pipeline_mode<synchronous>, transform_indices = @transform_4, window_bounds = array<i64: 1, 64>}, {pipeline_mode = #tpu.pipeline_mode<synchronous>, transform_indices = @transform_5, window_bounds = array<i64: 64, 64>}, {pipeline_mode = #tpu.pipeline_mode<synchronous>, transform_indices = @transform_6, window_bounds = array<i64: 1, 64>}, {pipeline_mode = #tpu.pipeline_mode<synchronous>, transform_indices = @transform_7, window_bounds = array<i64: 64, 64>}, {pipeline_mode = #tpu.pipeline_mode<synchronous>, transform_indices = @transform_8, window_bounds = array<i64: 1, 64>}, {transform_indices = @transform_9, window_bounds = array<i64: 8, 256>}]} {
    %c0 = arith.constant 0 : index
    %c0_0 = arith.constant 0 : index
    %0 = vector.load %arg1[%c0, %c0_0] : memref<8x784xf32, #tpu.memory_space<vmem>>, vector<8x784xf32>
    %c0_1 = arith.constant 0 : index
    %c0_2 = arith.constant 0 : index
    %1 = vector.load %arg2[%c0_1, %c0_2] : memref<784x64xf32, #tpu.memory_space<vmem>>, vector<784x64xf32>
    %cst = arith.constant dense<0.000000e+00> : vector<8x64xf32>
    %2 = tpu.matmul %0, %1, %cst {dimension_numbers = #tpu.dot_dimension_numbers<[1], [0], [0], [1], [0, 0, 1, 1], [], []>} : vector<8x784xf32>, vector<784x64xf32>, vector<8x64xf32> -> vector<8x64xf32>
    %c0_3 = arith.constant 0 : index
    %c0_4 = arith.constant 0 : index
    %3 = vector.load %arg3[%c0_3, %c0_4] : memref<1x64xf32, #tpu.memory_space<vmem>>, vector<1x64xf32>
    %4 = vector.broadcast %3 : vector<1x64xf32> to vector<8x64xf32>
    %5 = arith.addf %2, %4 : vector<8x64xf32>
    %cst_5 = arith.constant 0.000000e+00 : f32
    %6 = vector.broadcast %cst_5 : f32 to vector<8x64xf32>
    %7 = arith.maximumf %5, %6 : vector<8x64xf32>
    %c0_6 = arith.constant 0 : index
    %c0_7 = arith.constant 0 : index
    %8 = vector.load %arg4[%c0_6, %c0_7] : memref<64x64xf32, #tpu.memory_space<vmem>>, vector<64x64xf32>
    %cst_8 = arith.constant dense<0.000000e+00> : vector<8x64xf32>
    %9 = tpu.matmul %7, %8, %cst_8 {dimension_numbers = #tpu.dot_dimension_numbers<[1], [0], [0], [1], [0, 0, 1, 1], [], []>} : vector<8x64xf32>, vector<64x64xf32>, vector<8x64xf32> -> vector<8x64xf32>
    %c0_9 = arith.constant 0 : index
    %c0_10 = arith.constant 0 : index
    %10 = vector.load %arg5[%c0_9, %c0_10] : memref<1x64xf32, #tpu.memory_space<vmem>>, vector<1x64xf32>
    %11 = vector.broadcast %10 : vector<1x64xf32> to vector<8x64xf32>
    %12 = arith.addf %9, %11 : vector<8x64xf32>
    %cst_11 = arith.constant 0.000000e+00 : f32
    %13 = vector.broadcast %cst_11 : f32 to vector<8x64xf32>
    %14 = arith.maximumf %12, %13 : vector<8x64xf32>
    %c0_12 = arith.constant 0 : index
    %c0_13 = arith.constant 0 : index
    %15 = vector.load %arg6[%c0_12, %c0_13] : memref<64x64xf32, #tpu.memory_space<vmem>>, vector<64x64xf32>
    %cst_14 = arith.constant dense<0.000000e+00> : vector<8x64xf32>
    %16 = tpu.matmul %14, %15, %cst_14 {dimension_numbers = #tpu.dot_dimension_numbers<[1], [0], [0], [1], [0, 0, 1, 1], [], []>} : vector<8x64xf32>, vector<64x64xf32>, vector<8x64xf32> -> vector<8x64xf32>
    %c0_15 = arith.constant 0 : index
    %c0_16 = arith.constant 0 : index
    %17 = vector.load %arg7[%c0_15, %c0_16] : memref<1x64xf32, #tpu.memory_space<vmem>>, vector<1x64xf32>
    %18 = vector.broadcast %17 : vector<1x64xf32> to vector<8x64xf32>
    %19 = arith.addf %16, %18 : vector<8x64xf32>
    %cst_17 = arith.constant 0.000000e+00 : f32
    %20 = vector.broadcast %cst_17 : f32 to vector<8x64xf32>
    %21 = arith.maximumf %19, %20 : vector<8x64xf32>
    %c0_18 = arith.constant 0 : index
    %c0_19 = arith.constant 0 : index
    %22 = vector.load %arg8[%c0_18, %c0_19] : memref<64x64xf32, #tpu.memory_space<vmem>>, vector<64x64xf32>
    %cst_20 = arith.constant dense<0.000000e+00> : vector<8x64xf32>
    %23 = tpu.matmul %21, %22, %cst_20 {dimension_numbers = #tpu.dot_dimension_numbers<[1], [0], [0], [1], [0, 0, 1, 1], [], []>} : vector<8x64xf32>, vector<64x64xf32>, vector<8x64xf32> -> vector<8x64xf32>
    %c0_21 = arith.constant 0 : index
    %c0_22 = arith.constant 0 : index
    %24 = vector.load %arg9[%c0_21, %c0_22] : memref<1x64xf32, #tpu.memory_space<vmem>>, vector<1x64xf32>
    %25 = vector.broadcast %24 : vector<1x64xf32> to vector<8x64xf32>
    %26 = arith.addf %23, %25 : vector<8x64xf32>
    %27 = tpu.iota {dimensions = array<i32: 1>} : vector<8x64xi32>
    %c10_i32 = arith.constant 10 : i32
    %28 = vector.broadcast %c10_i32 : i32 to vector<8x64xi32>
    %29 = arith.cmpi slt, %27, %28 : vector<8x64xi32>
    %cst_23 = arith.constant 0xFF800000 : f32
    %30 = vector.broadcast %cst_23 : f32 to vector<8x64xf32>
    %31 = arith.select %29, %26, %30 : vector<8x64xi1>, vector<8x64xf32>
    %cst_24 = arith.constant dense<0xFF800000> : vector<8xf32>
    %32 = vector.multi_reduction <maximumf>, %31, %cst_24 [1] : vector<8x64xf32> to vector<8xf32>
    %33 = vector.shape_cast %32 : vector<8xf32> to vector<8x1xf32>
    %34 = vector.broadcast %33 : vector<8x1xf32> to vector<8x64xf32>
    %35 = arith.subf %31, %34 : vector<8x64xf32>
    %36 = math.exp %35 : vector<8x64xf32>
    %cst_25 = arith.constant dense<0.000000e+00> : vector<8xf32>
    %37 = vector.multi_reduction <add>, %36, %cst_25 [1] : vector<8x64xf32> to vector<8xf32>
    %38 = vector.shape_cast %37 : vector<8xf32> to vector<8x1xf32>
    %39 = math.log %38 : vector<8x1xf32>
    %40 = vector.broadcast %39 : vector<8x1xf32> to vector<8x64xf32>
    %41 = arith.subf %35, %40 : vector<8x64xf32>
    %cst_26 = arith.constant 0.000000e+00 : f32
    %42 = vector.broadcast %cst_26 : f32 to vector<8x64xf32>
    %43 = arith.select %29, %41, %42 : vector<8x64xi1>, vector<8x64xf32>
    %44 = math.sqrt %7 : vector<8x64xf32>
    %45 = math.sqrt %14 : vector<8x64xf32>
    %46 = math.sqrt %21 : vector<8x64xf32>
    %47 = tpu.concatenate %44, %45, %46, %43 in 1 : vector<8x64xf32>, vector<8x64xf32>, vector<8x64xf32>, vector<8x64xf32> -> vector<8x256xf32>
    %c0_27 = arith.constant 0 : index
    %c0_28 = arith.constant 0 : index
    %48 = vector.load %arg10[%c0_27, %c0_28] : memref<8x256xf32, #tpu.memory_space<vmem>>, vector<8x256xf32>
    tpu.vector_store %arg10[%c0_27, %c0_28], %47 {strides = array<i32>} : memref<8x256xf32, #tpu.memory_space<vmem>>, vector<8x256xf32>,
    return
  }
  func.func @transform_0(%arg0: i32) -> (i32, i32) {
    %c0_i32 = arith.constant 0 : i32
    %c0_i32_0 = arith.constant 0 : i32
    return %arg0, %c0_i32 : i32, i32
  }
  func.func @transform_1(%arg0: i32) -> (i32, i32) {
    %c0_i32 = arith.constant 0 : i32
    %c0_i32_0 = arith.constant 0 : i32
    %c0_i32_1 = arith.constant 0 : i32
    return %c0_i32, %c0_i32_0 : i32, i32
  }
  func.func @transform_2(%arg0: i32) -> (i32, i32) {
    %c0_i32 = arith.constant 0 : i32
    %c0_i32_0 = arith.constant 0 : i32
    %c0_i32_1 = arith.constant 0 : i32
    return %c0_i32, %c0_i32_0 : i32, i32
  }
  func.func @transform_3(%arg0: i32) -> (i32, i32) {
    %c0_i32 = arith.constant 0 : i32
    %c0_i32_0 = arith.constant 0 : i32
    %c0_i32_1 = arith.constant 0 : i32
    return %c0_i32, %c0_i32_0 : i32, i32
  }
  func.func @transform_4(%arg0: i32) -> (i32, i32) {
    %c0_i32 = arith.constant 0 : i32
    %c0_i32_0 = arith.constant 0 : i32
    %c0_i32_1 = arith.constant 0 : i32
    return %c0_i32, %c0_i32_0 : i32, i32
  }
  func.func @transform_5(%arg0: i32) -> (i32, i32) {
    %c0_i32 = arith.constant 0 : i32
    %c0_i32_0 = arith.constant 0 : i32
    %c0_i32_1 = arith.constant 0 : i32
    return %c0_i32, %c0_i32_0 : i32, i32
  }
  func.func @transform_6(%arg0: i32) -> (i32, i32) {
    %c0_i32 = arith.constant 0 : i32
    %c0_i32_0 = arith.constant 0 : i32
    %c0_i32_1 = arith.constant 0 : i32
    return %c0_i32, %c0_i32_0 : i32, i32
  }
  func.func @transform_7(%arg0: i32) -> (i32, i32) {
    %c0_i32 = arith.constant 0 : i32
    %c0_i32_0 = arith.constant 0 : i32
    %c0_i32_1 = arith.constant 0 : i32
    return %c0_i32, %c0_i32_0 : i32, i32
  }
  func.func @transform_8(%arg0: i32) -> (i32, i32) {
    %c0_i32 = arith.constant 0 : i32
    %c0_i32_0 = arith.constant 0 : i32
    %c0_i32_1 = arith.constant 0 : i32
    return %c0_i32, %c0_i32_0 : i32, i32
  }
  func.func @transform_9(%arg0: i32) -> (i32, i32) {
    %c0_i32 = arith.constant 0 : i32
    %c0_i32_0 = arith.constant 0 : i32
    return %arg0, %c0_i32 : i32, i32
  }
}

</mosaic_0001>

<bundles_post_ra>
// kernel: mynet_forward.1
= control target key start
LH: loop header
LB: loop body
LE: loop exit
PB: predicated region body
PF: predicated region fallthrough
CT: control target
= control target key end

     0   :  { %vm1107_vm0 = vmmov 0   ;;  %vm144_vm1 = vcmask 130048   ;;  %vm444_vm2 = vcmask 523264   ;;  %s1109_s27 = smov 64   ;;  %s1606_s1 = inlined_call_operand.vmem [shape: f32[784,64], index: 1, kind: input, shape index: {}]   ;;  %s1607_s0 = inlined_call_operand.vmem [shape: f32[8,784], index: 0, kind: input, shape index: {}]   ;;  %s1608_s3 = inlined_call_operand.vmem [shape: f32[64,64], index: 3, kind: input, shape index: {}]   ;;  %s1609_s2 = inlined_call_operand.vmem [shape: f32[1,64], index: 2, kind: input, shape index: {}]   ;;  %s1610_s5 = inlined_call_operand.vmem [shape: f32[64,64], index: 5, kind: input, shape index: {}]   ;;  %s1611_s4 = inlined_call_operand.vmem [shape: f32[1,64], index: 4, kind: input, shape index: {}]   ;;  %s1612_s7 = inlined_call_operand.vmem [shape: f32[64,64], index: 7, kind: input, shape index: {}]   ;;  %s1613_s9 = inlined_call_operand.vmem [shape: f32[8,256], index: 9, kind: output, shape index: {}]   ;;  %s1614_s6 = inlined_call_operand.vmem [shape: f32[1,64], index: 6, kind: input, shape index: {}]   ;;  %s1615_s8 = inlined_call_operand.vmem [shape: f32[1,64], index: 8, kind: input, shape index: {}]  }
   0x1   :  { %v55_v0 = vld [vmem:[%s1606_s1 + $0x80] sm:$0xff]  ;;  %v56_v1 = vld [vmem:[%s1606_s1 + $0x88] sm:$0xff]  ;;  %v57_v11 = vld [vmem:[%s1606_s1 + $0x90] sm:$0xff] }
   0x2   :  { %v39_v2 = vld [vmem:[%s1606_s1] sm:$0xff]  ;;  %v957_v3 = vpack.c.bf16 %v56_v1, %v55_v0  ;;  %v40_v4 = vld [vmem:[%s1606_s1 + $0x8] sm:$0xff]  ;;  %v58_v13 = vld [vmem:[%s1606_s1 + $0x98] sm:$0xff] }
   0x3   :  { %v87_v5 = vld [vmem:[%s1606_s1 + $0x180] sm:$0xff]  ;;  %v88_v6 = vld [vmem:[%s1606_s1 + $0x188] sm:$0xff]  ;;  %v959_v7 = vpack.c.bf16 %v40_v4, %v39_v2  ;;  %v41_v14 = vld [vmem:[%s1606_s1 + $0x10] sm:$0xff]  ;;  %v961_v16 = vpack.c.bf16 %v58_v13, %v57_v11 }
   0x4   :  { %v989_v8 = vpack.c.bf16 %v88_v6, %v87_v5  ;;  %v71_v9 = vld [vmem:[%s1606_s1 + $0x100] sm:$0xff]  ;;  %v72_v10 = vld [vmem:[%s1606_s1 + $0x108] sm:$0xff]  ;;  %958 = vmatprep.subr.bf16.mxu0 %v957_v3  ;;  %v42_v15 = vld [vmem:[%s1606_s1 + $0x18] sm:$0xff] }
   0x5   :  { %v991_v12 = vpack.c.bf16 %v72_v10, %v71_v9  ;;  %960 = vmatpush3.bf16.msra.mxu0 %v959_v7  ;;  %v963_v17 = vpack.c.bf16 %v42_v15, %v41_v14  ;;  %v89_v18 = vld [vmem:[%s1606_s1 + $0x190] sm:$0xff]  ;;  %v90_v19 = vld [vmem:[%s1606_s1 + $0x198] sm:$0xff]  ;;  %v59_v23 = vld [vmem:[%s1606_s1 + $0xa0] sm:$0xff] }
   0x6   :  { %990 = vmatprep.subr.bf16.mxu1 %v989_v8  ;;  %v73_v20 = vld [vmem:[%s1606_s1 + $0x110] sm:$0xff]  ;;  %v993_v21 = vpack.c.bf16 %v90_v19, %v89_v18  ;;  %v74_v22 = vld [vmem:[%s1606_s1 + $0x118] sm:$0xff]  ;;  %v60_v24 = vld [vmem:[%s1606_s1 + $0xa8] sm:$0xff]  ;;  %962 = vmatprep.subr.bf16.mxu0 %v961_v16 }
   0x7   :  { %992 = vmatpush3.bf16.msra.mxu1 %v991_v12  ;;  %v995_v25 = vpack.c.bf16 %v74_v22, %v73_v20  ;;  %v965_v26 = vpack.c.bf16 %v60_v24, %v59_v23  ;;  %v43_v27 = vld [vmem:[%s1606_s1 + $0x20] sm:$0xff]  ;;  %v44_v28 = vld [vmem:[%s1606_s1 + $0x28] sm:$0xff]  ;;  %v61_v35 = vld [vmem:[%s1606_s1 + $0xb0] sm:$0xff] }
   0x8   :  { %v91_v29 = vld [vmem:[%s1606_s1 + $0x1a0] sm:$0xff]  ;;  %994 = vmatprep.subr.bf16.mxu1 %v993_v21  ;;  %v92_v30 = vld [vmem:[%s1606_s1 + $0x1a8] sm:$0xff]  ;;  %v967_v33 = vpack.c.bf16 %v44_v28, %v43_v27  ;;  %v62_v36 = vld [vmem:[%s1606_s1 + $0xb8] sm:$0xff] }
   0x9   :  { %v75_v31 = vld [vmem:[%s1606_s1 + $0x120] sm:$0xff]  ;;  %v76_v32 = vld [vmem:[%s1606_s1 + $0x128] sm:$0xff]  ;;  %964 = vmatpush3.bf16.msra.mxu0 %v963_v17  ;;  %v997_v34 = vpack.c.bf16 %v92_v30, %v91_v29  ;;  %v45_v37 = vld [vmem:[%s1606_s1 + $0x30] sm:$0xff]  ;;  %v969_v39 = vpack.c.bf16 %v62_v36, %v61_v35 }
   0xa   :  { %966 = vmatprep.subr.bf16.mxu0 %v965_v26  ;;  %v999_v38 = vpack.c.bf16 %v76_v32, %v75_v31  ;;  %v46_v40 = vld [vmem:[%s1606_s1 + $0x38] sm:$0xff]  ;;  %v93_v41 = vld [vmem:[%s1606_s1 + $0x1b0] sm:$0xff]  ;;  %v63_v46 = vld [vmem:[%s1606_s1 + $0xc0] sm:$0xff] }
   0xb   :  { %996 = vmatpush3.bf16.msra.mxu1 %v995_v25  ;;  %v94_v42 = vld [vmem:[%s1606_s1 + $0x1b8] sm:$0xff]  ;;  %v77_v44 = vld [vmem:[%s1606_s1 + $0x130] sm:$0xff]  ;;  %v64_v47 = vld [vmem:[%s1606_s1 + $0xc8] sm:$0xff]  ;;  %v971_v48 = vpack.c.bf16 %v46_v40, %v45_v37 }
   0xc   :  { %998 = vmatprep.subr.bf16.mxu1 %v997_v34  ;;  %v1001_v43 = vpack.c.bf16 %v94_v42, %v93_v41  ;;  %v78_v45 = vld [vmem:[%s1606_s1 + $0x138] sm:$0xff]  ;;  %v95_v49 = vld [vmem:[%s1606_s1 + $0x1c0] sm:$0xff]  ;;  %v96_v50 = vld [vmem:[%s1606_s1 + $0x1c8] sm:$0xff]  ;;  %v973_v52 = vpack.c.bf16 %v64_v47, %v63_v46 }
   0xd   :  { %968 = vmatpush3.bf16.msra.mxu0 %v967_v33  ;;  %v1003_v51 = vpack.c.bf16 %v78_v45, %v77_v44  ;;  %v47_v53 = vld [vmem:[%s1606_s1 + $0x40] sm:$0xff]  ;;  %v48_v54 = vld [vmem:[%s1606_s1 + $0x48] sm:$0xff]  ;;  %v1005_v56 = vpack.c.bf16 %v96_v50, %v95_v49  ;;  %v65_v58 = vld [vmem:[%s1606_s1 + $0xd0] sm:$0xff]  ;;  %v1106_v50 = vmov 0.0|0.0  }
   0xe   :  { %970 = vmatprep.subr.bf16.mxu0 %v969_v39  ;;  %v79_v55 = vld [vmem:[%s1606_s1 + $0x140] sm:$0xff]  ;;  %v80_v57 = vld [vmem:[%s1606_s1 + $0x148] sm:$0xff]  ;;  %v66_v59 = vld [vmem:[%s1606_s1 + $0xd8] sm:$0xff]  ;;  %v975_v62 = vpack.c.bf16 %v48_v54, %v47_v53 }
   0xf   :  { %1000 = vmatpush3.bf16.msra.mxu1 %v999_v38  ;;  %v97_v60 = vld [vmem:[%s1606_s1 + $0x1d0] sm:$0xff]  ;;  %v98_v61 = vld [vmem:[%s1606_s1 + $0x1d8] sm:$0xff]  ;;  %v1007_v63 = vpack.c.bf16 %v80_v57, %v79_v55  ;;  %v977_v0 = vpack.c.bf16 %v66_v59, %v65_v58  ;;  %v67_v6 = vld [vmem:[%s1606_s1 + $0xe0] sm:$0xff] }
  0x10   :  { %1002 = vmatprep.subr.bf16.mxu1 %v1001_v43  ;;  %v49_v1 = vld [vmem:[%s1606_s1 + $0x50] sm:$0xff]  ;;  %v50_v2 = vld [vmem:[%s1606_s1 + $0x58] sm:$0xff]  ;;  %v1009_v4 = vpack.c.bf16 %v98_v61, %v97_v60  ;;  %v68_v7 = vld [vmem:[%s1606_s1 + $0xe8] sm:$0xff]  ;;  %v1108_v60 = vmov 0.0  }
  0x11   :  { %972 = vmatpush3.bf16.msra.mxu0 %v971_v48  ;;  %v81_v3 = vld [vmem:[%s1606_s1 + $0x150] sm:$0xff]  ;;  %v82_v5 = vld [vmem:[%s1606_s1 + $0x158] sm:$0xff]  ;;  %v99_v8 = vld [vmem:[%s1606_s1 + $0x1e0] sm:$0xff]  ;;  %v979_v10 = vpack.c.bf16 %v50_v2, %v49_v1  ;;  %v981_v14 = vpack.c.bf16 %v68_v7, %v67_v6 }
  0x12   :  { %974 = vmatprep.subr.bf16.mxu0 %v973_v52  ;;  %v100_v9 = vld [vmem:[%s1606_s1 + $0x1e8] sm:$0xff]  ;;  %v51_v11 = vld [vmem:[%s1606_s1 + $0x60] sm:$0xff]  ;;  %v1011_v13 = vpack.c.bf16 %v82_v5, %v81_v3  ;;  %v69_v19 = vld [vmem:[%s1606_s1 + $0xf0] sm:$0xff] }
  0x13   :  { %1004 = vmatpush3.bf16.msra.mxu1 %v1003_v51  ;;  %v33_v12 = vld [vmem:[%s1607_s0 + $0x8] sm:$0xff]  ;;  %v83_v16 = vld [vmem:[%s1606_s1 + $0x160] sm:$0xff]  ;;  %v1013_v18 = vpack.c.bf16 %v100_v9, %v99_v8  ;;  %v70_v20 = vld [vmem:[%s1606_s1 + $0xf8] sm:$0xff] }
  0x14   :  { %1006 = vmatprep.subr.bf16.mxu1 %v1005_v56  ;;  %v52_v15 = vld [vmem:[%s1606_s1 + $0x68] sm:$0xff]  ;;  %212 = vmatprep.mubr.f32.mxu0 %v33_v12  ;;  %v35_v21 = vld [vmem:[%s1607_s0 + $0x18] sm:$0xff]  ;;  %v101_v22 = vld [vmem:[%s1606_s1 + $0x1f0] sm:$0xff]  ;;  %v985_v26 = vpack.c.bf16 %v70_v20, %v69_v19 }
  0x15   :  { %976 = vmatpush3.bf16.msra.mxu0 %v975_v62  ;;  %v84_v17 = vld [vmem:[%s1606_s1 + $0x168] sm:$0xff]  ;;  %v102_v23 = vld [vmem:[%s1606_s1 + $0x1f8] sm:$0xff]  ;;  %282 = vmatprep.mubr.f32.mxu1 %v35_v21  ;;  %v983_v24 = vpack.c.bf16 %v52_v15, %v51_v11  ;;  %v53_v27 = vld [vmem:[%s1606_s1 + $0x70] sm:$0xff] }
  0x16   :  { %978 = vmatprep.subr.bf16.mxu0 %v977_v0  ;;  %v1015_v25 = vpack.c.bf16 %v84_v17, %v83_v16  ;;  %v54_v28 = vld [vmem:[%s1606_s1 + $0x78] sm:$0xff]  ;;  %v85_v29 = vld [vmem:[%s1606_s1 + $0x170] sm:$0xff]  ;;  %v1017_v30 = vpack.c.bf16 %v102_v23, %v101_v22  ;;  %v119_v32 = vld [vmem:[%s1606_s1 + $0x280] sm:$0xff] }
  0x17   :  { %1008 = vmatpush3.bf16.msra.mxu1 %v1007_v63  ;;  %v86_v31 = vld [vmem:[%s1606_s1 + $0x178] sm:$0xff]  ;;  %v120_v33 = vld [vmem:[%s1606_s1 + $0x288] sm:$0xff]  ;;  %v987_v34 = vpack.c.bf16 %v54_v28, %v53_v27  ;;  %v103_v37 = vld [vmem:[%s1606_s1 + $0x200] sm:$0xff] }
  0x18   :  { %1010 = vmatprep.subr.bf16.mxu1 %v1009_v4  ;;  %v1019_v35 = vpack.c.bf16 %v86_v31, %v85_v29  ;;  %v1021_v36 = vpack.c.bf16 %v120_v33, %v119_v32  ;;  %v104_v38 = vld [vmem:[%s1606_s1 + $0x208] sm:$0xff]  ;;  %v121_v39 = vld [vmem:[%s1606_s1 + $0x290] sm:$0xff]  ;;  %v122_v40 = vld [vmem:[%s1606_s1 + $0x298] sm:$0xff] }
  0x19   :  { %980 = vmatpush3.bf16.msra.mxu0 %v979_v10  ;;  %v32_v41 = vld [vmem:[%s1607_s0] sm:$0xff]  ;;  %v1023_v42 = vpack.c.bf16 %v104_v38, %v103_v37  ;;  %v34_v43 = vld [vmem:[%s1607_s0 + $0x10] sm:$0xff]  ;;  %v1025_v45 = vpack.c.bf16 %v122_v40, %v121_v39  ;;  %v106_v46 = vld [vmem:[%s1606_s1 + $0x218] sm:$0xff] }
  0x1a   :  { %982 = vmatprep.subr.bf16.mxu0 %v981_v14  ;;  %v105_v44 = vld [vmem:[%s1606_s1 + $0x210] sm:$0xff]  ;;  %v123_v47 = vld [vmem:[%s1606_s1 + $0x2a0] sm:$0xff]  ;;  %v124_v48 = vld [vmem:[%s1606_s1 + $0x2a8] sm:$0xff] }
  0x1b   :  { %1012 = vmatpush3.bf16.msra.mxu1 %v1011_v13  ;;  %v37_v49 = vld [vmem:[%s1607_s0 + $0x28] sm:$0xff]  ;;  %v135_v51 = vld [vmem:[%s1606_s1 + $0x300] sm:$0xff]  ;;  %v1027_v54 = vpack.c.bf16 %v106_v46, %v105_v44  ;;  %v1029_v55 = vpack.c.bf16 %v124_v48, %v123_v47  ;;  %v125_v58 = vld [vmem:[%s1606_s1 + $0x2b0] sm:$0xff] }
  0x1c   :  { %1014 = vmatprep.subr.bf16.mxu1 %v1013_v18  ;;  %v136_v52 = vld [vmem:[%s1606_s1 + $0x308] sm:$0xff]  ;;  %v107_v56 = vld [vmem:[%s1606_s1 + $0x220] sm:$0xff]  ;;  %v126_v59 = vld [vmem:[%s1606_s1 + $0x2b8] sm:$0xff] }
  0x1d   :  { %984 = vmatpush3.bf16.msra.mxu0 %v983_v24  ;;  %v1054_v53 = vpack.c.bf16 %v136_v52, %v135_v51  ;;  %v108_v57 = vld [vmem:[%s1606_s1 + $0x228] sm:$0xff]  ;;  %v38_v61 = vld [vmem:[%s1607_s0 + $0x30] sm:$0xff]  ;;  %v1033_v63 = vpack.c.bf16 %v126_v59, %v125_v58  ;;  %v110_v1 = vld [vmem:[%s1606_s1 + $0x238] sm:$0xff] }
  0x1e   :  { %986 = vmatprep.subr.bf16.mxu0 %v985_v26  ;;  %v1031_v62 = vpack.c.bf16 %v108_v57, %v107_v56  ;;  %v109_v0 = vld [vmem:[%s1606_s1 + $0x230] sm:$0xff]  ;;  %v127_v2 = vld [vmem:[%s1606_s1 + $0x2c0] sm:$0xff]  ;;  %v128_v3 = vld [vmem:[%s1606_s1 + $0x2c8] sm:$0xff] }
  0x1f   :  { %1016 = vmatpush3.bf16.msra.mxu1 %v1015_v25  ;;  %v1035_v4 = vpack.c.bf16 %v110_v1, %v109_v0  ;;  %v1037_v5 = vpack.c.bf16 %v128_v3, %v127_v2  ;;  %v111_v6 = vld [vmem:[%s1606_s1 + $0x240] sm:$0xff]  ;;  %v112_v7 = vld [vmem:[%s1606_s1 + $0x248] sm:$0xff]  ;;  %v129_v8 = vld [vmem:[%s1606_s1 + $0x2d0] sm:$0xff] }
  0x20   :  { %1018 = vmatprep.subr.bf16.mxu1 %v1017_v30  ;;  %v130_v9 = vld [vmem:[%s1606_s1 + $0x2d8] sm:$0xff]  ;;  %v1039_v10 = vpack.c.bf16 %v112_v7, %v111_v6  ;;  %v113_v12 = vld [vmem:[%s1606_s1 + $0x250] sm:$0xff]  ;;  %v131_v14 = vld [vmem:[%s1606_s1 + $0x2e0] sm:$0xff] }
  0x21   :  { %988 = vmatpush3.bf16.msra.mxu0 %v987_v34  ;;  %v1041_v11 = vpack.c.bf16 %v130_v9, %v129_v8  ;;  %v114_v13 = vld [vmem:[%s1606_s1 + $0x258] sm:$0xff]  ;;  %v132_v15 = vld [vmem:[%s1606_s1 + $0x2e8] sm:$0xff]  ;;  %v115_v18 = vld [vmem:[%s1606_s1 + $0x260] sm:$0xff] }
  0x22   :  { %1022 = vmatprep.subr.bf16.mxu0 %v1021_v36  ;;  %v1043_v16 = vpack.c.bf16 %v114_v13, %v113_v12  ;;  %v1045_v17 = vpack.c.bf16 %v132_v15, %v131_v14  ;;  %v116_v19 = vld [vmem:[%s1606_s1 + $0x268] sm:$0xff]  ;;  %v133_v20 = vld [vmem:[%s1606_s1 + $0x2f0] sm:$0xff]  ;;  %v134_v21 = vld [vmem:[%s1606_s1 + $0x2f8] sm:$0xff] }
  0x23   :  { %1020 = vmatpush3.bf16.msra.mxu1 %v1019_v35  ;;  %v1047_v22 = vpack.c.bf16 %v116_v19, %v115_v18  ;;  %v1049_v23 = vpack.c.bf16 %v134_v21, %v133_v20  ;;  %v117_v24 = vld [vmem:[%s1606_s1 + $0x270] sm:$0xff]  ;;  %v118_v25 = vld [vmem:[%s1606_s1 + $0x278] sm:$0xff]  ;;  %v36_v27 = vld [vmem:[%s1607_s0 + $0x20] sm:$0xff] }
  0x24   :  { %1053 = vmatprep.subr.bf16.mxu1 %v1106_v50  ;;  %213 = vmatmul.mubr.f32.vlgmr.msra.gmra.mrb[0].mxu0 %v32_v41  ;;  %v1051_v26 = vpack.c.bf16 %v118_v25, %v117_v24  ;;  %v429_v28 = vld [vmem:[%s1608_s3] sm:$0xff]  ;;  %v430_v29 = vld [vmem:[%s1608_s3 + $0x8] sm:$0xff]  ;;  %v431_v30 = vld [vmem:[%s1608_s3 + $0x10] sm:$0xff] }
  0x25   :  { %1024 = vmatpush3.bf16.msra.mxu0 %v1023_v42  ;;  %352 = vmatprep.mubr.f32.mxu0 %v37_v49  ;;  %v1057_v31 = vpack.c.bf16 %v430_v29, %v429_v28  ;;  %v432_v32 = vld [vmem:[%s1608_s3 + $0x18] sm:$0xff]  ;;  %v433_v34 = vld [vmem:[%s1608_s3 + $0x20] sm:$0xff]  ;;  %v434_v35 = vld [vmem:[%s1608_s3 + $0x28] sm:$0xff] }
  0x26   :  { %283 = vmatmul.mubr.f32.vlgmr.msra.gmra.mrb[0].mxu1 %v34_v43  ;;  %1026 = vmatprep.subr.bf16.mxu0 %v1025_v45  ;;  %v1060_v33 = vpack.c.bf16 %v432_v32, %v431_v30  ;;  %v1063_v36 = vpack.c.bf16 %v434_v35, %v433_v34  ;;  %v435_v37 = vld [vmem:[%s1608_s3 + $0x30] sm:$0xff]  ;;  %v436_v38 = vld [vmem:[%s1608_s3 + $0x38] sm:$0xff]  ;;  %v750_v41 = vld [vmem:[%s1609_s2] ss:$0 sm:$0xff] }
  0x27   :  { %1055 = vmatpush3.bf16.msra.mxu1 %v1054_v53  ;;  %897 = vmatprep.mubr.msk.f32.mxu1 %vm1107_vm0, %v1108_v60  ;;  %v1066_v39 = vpack.c.bf16 %v436_v38, %v435_v37  ;;  %v519_v56 = vld [vmem:[%s1610_s5] sm:$0xff]  ;;  %v520_v57 = vld [vmem:[%s1610_s5 + $0x8] sm:$0xff]  ;;  %v610_v13 = vld [vmem:[%s1612_s7 + $0x10] sm:$0xff] }
  0x28   :  { %1056 = vmatprep.subr.bf16.mxu1 %v1106_v50  ;;  %v1069_v59 = vpack.c.bf16 %v520_v57, %v519_v56  ;;  %v523_v1 = vld [vmem:[%s1610_s5 + $0x20] sm:$0xff]  ;;  %v524_v2 = vld [vmem:[%s1610_s5 + $0x28] sm:$0xff]  ;;  %v611_v15 = vld [vmem:[%s1612_s7 + $0x18] sm:$0xff] }
  0x29   :  { %1028 = vmatpush3.bf16.msra.mxu0 %v1027_v54  ;;  %v1075_v3 = vpack.c.bf16 %v524_v2, %v523_v1  ;;  %v752_v6 = vld [vmem:[%s1611_s4] ss:$0 sm:$0xff]  ;;  %v609_v12 = vld [vmem:[%s1612_s7 + $0x8] sm:$0xff]  ;;  %v614_v25 = vld [vmem:[%s1612_s7 + $0x30] sm:$0xff] }
  0x2a   :  { %1030 = vmatprep.subr.bf16.mxu0 %v1029_v55  ;;  %898 = vmatmul.mubr.msk.f32.vlgmr.msra.gmra.mrb[2].mxu1 %vm144_vm1, %v38_v61  ;;  %v613_v18 = vld [vmem:[%s1612_s7 + $0x28] sm:$0xff]  ;;  %v754_v34 = vld [vmem:[%s1614_s6] ss:$0 sm:$0xff] }
  0x2b   :  { %916 = vmatprep.mubr.msk.f32.mxu1 %vm1107_vm0, %v1108_v60  ;;  %1058 = vmatpush3.bf16.msra.mxu1 %v1057_v31 }
  0x2c   :  { %1059 = vmatprep.subr.bf16.mxu1 %v1106_v50 }
  0x2d   :  { %1032 = vmatpush3.bf16.msra.mxu0 %v1031_v62  ;;  %v521_v62 = vld [vmem:[%s1610_s5 + $0x10] sm:$0xff] }
  0x2e   :  { %1034 = vmatprep.subr.bf16.mxu0 %v1033_v63  ;;  %v522_v63 = vld [vmem:[%s1610_s5 + $0x18] sm:$0xff] }
  0x2f   :  { %1061 = vmatpush3.bf16.msra.mxu1 %v1060_v33  ;;  %v1072_v0 = vpack.c.bf16 %v522_v63, %v521_v62 }
  0x30   :  { %1062 = vmatprep.subr.bf16.mxu1 %v1106_v50 }
  0x31   :  { %1036 = vmatpush3.bf16.msra.mxu0 %v1035_v4  ;;  %v526_v4 = vld [vmem:[%s1610_s5 + $0x38] sm:$0xff] }
  0x32   :  { %1038 = vmatprep.subr.bf16.mxu0 %v1037_v5 }
  0x33   :  { %1064 = vmatpush3.bf16.msra.mxu1 %v1063_v36 }
  0x34   :  { %1065 = vmatprep.subr.bf16.mxu1 %v1106_v50 }
  0x35   :  { %1040 = vmatpush3.bf16.msra.mxu0 %v1039_v10 }
  0x36   :  { %1042 = vmatprep.subr.bf16.mxu0 %v1041_v11  ;;  %v608_v11 = vld [vmem:[%s1612_s7] sm:$0xff] }
  0x37   :  { %1067 = vmatpush3.bf16.msra.mxu1 %v1066_v39  ;;  %v1081_v14 = vpack.c.bf16 %v609_v12, %v608_v11  ;;  %v696_v39 = vlaneseq }
  0x38   :  { %1068 = vmatprep.subr.bf16.mxu1 %v1106_v50 }
  0x39   :  { %1044 = vmatpush3.bf16.msra.mxu0 %v1043_v16  ;;  %v1084_v16 = vpack.c.bf16 %v611_v15, %v610_v13 }
  0x3a   :  { %1046 = vmatprep.subr.bf16.mxu0 %v1045_v17  ;;  %v612_v17 = vld [vmem:[%s1612_s7 + $0x20] sm:$0xff] }
  0x3b   :  { %v1087_v21 = vpack.c.bf16 %v613_v18, %v612_v17 }
  0x3d   :  { %1048 = vmatpush3.bf16.msra.mxu0 %v1047_v22 }
  0x3e   :  { %1050 = vmatprep.subr.bf16.mxu0 %v1049_v23 }
  0x41   :  { %1052 = vmatpush3.bf16.msra.mxu0 %v1051_v26  ;;  %v615_v26 = vld [vmem:[%s1612_s7 + $0x38] sm:$0xff] }
  0x42   :  { %1080 = vmatprep.subr.bf16.mxu0 %v1106_v50 }
  0x44   :  { %353 = vmatmul.mubr.f32.vlgmr.msra.gmra.mrb[2].mxu0 %v36_v27  ;;  %v1090_v27 = vpack.c.bf16 %v615_v26, %v614_v25 }
  0x45   :  { %954 = vmatprep.mubr.msk.f32.mxu0 %vm1107_vm0, %v1108_v60  ;;  %1082 = vmatpush3.bf16.msra.mxu0 %v1081_v14 }
  0x46   :  { %1083 = vmatprep.subr.bf16.mxu0 %v1106_v50 }
  0x49   :  { %1085 = vmatpush3.bf16.msra.mxu0 %v1084_v16 }
  0x4a   :  { %1086 = vmatprep.subr.bf16.mxu0 %v1106_v50 }
  0x4d   :  { %1088 = vmatpush3.bf16.msra.mxu0 %v1087_v21 }
  0x4e   :  { %1089 = vmatprep.subr.bf16.mxu0 %v1106_v50 }
  0x51   :  { %1091 = vmatpush3.bf16.msra.mxu0 %v1090_v27 }
  0xf7   :  { %v790_v40 = vpop.f32.mrb[0].mxu0 }
  0xf8   :  { %v791_v42 = vpop.f32.mrb[1].mxu0 }
  0xf9   :  { %v825_v43 = vpop.f32.mrb[0].mxu1  ;;  %v792_v44 = vadd.f32 %v791_v42, %v790_v40  ;;  %v697_v40 = vand.u32 127, %v696_v39 }
  0xfa   :  { %v826_v45 = vpop.f32.mrb[1].mxu1 }
  0xfb   :  { %v827_v46 = vadd.f32 %v826_v45, %v825_v43  ;;  %v215_v47 = vadd.f32 %v792_v44, %v750_v41  ;;  %v756_v41 = vld [vmem:[%s1615_s8] ss:$0 sm:$0xff]  ;;  %vm698_vm7 = vcmp.lt.s32.totalorder %v697_v40, 10 }
  0xfd   :  { %v285_v48 = vadd.f32 %v827_v46, %v215_v47  ;;  %v424_v49 = vpop.f32.mrb[2].mxu1 }
  0xfe   :  { %v899_v51 = vpop.f32.mrb[3].mxu1 }
 0x117   :  { %v860_v52 = vpop.f32.mrb[2].mxu0 }
 0x118   :  { %v861_v53 = vpop.f32.mrb[3].mxu0 }
 0x119   :  { %v862_v54 = vadd.f32 %v861_v53, %v860_v52 }
 0x11b   :  { %v355_v55 = vadd.f32 %v862_v54, %v285_v48 }
 0x11d   :  { %v425_v58 = vadd.f32 %v424_v49, %v355_v55 }
 0x11f   :  { %v1521_v61 = vmax.f32 %v425_v58, 0.0 }
 0x121   :  { %917 = vmatmul.mubr.msk.f32.vlgmr.msra.gmra.mrb[4].mxu1 %vm444_vm2, %v1521_v61  ;;  %vm715_vm5 = vcmp.eq.f32.partialorder %v1521_v61, inf  ;;  %vm717_vm6 = vcmp.eq.f32.partialorder %v1521_v61, 0.0 }
 0x122   :  { %1070 = vmatpush3.bf16.msra.mxu1 %v1069_v59  ;;  %935 = vmatprep.mubr.msk.f32.mxu1 %vm1107_vm0, %v1108_v60  ;;  %v525_v60 = vld [vmem:[%s1610_s5 + $0x30] sm:$0xff] }
 0x123   :  { %1071 = vmatprep.subr.bf16.mxu1 %v1106_v50  ;;  %v1078_v5 = vpack.c.bf16 %v526_v4, %v525_v60 }
 0x126   :  { %1073 = vmatpush3.bf16.msra.mxu1 %v1072_v0 }
 0x127   :  { %1074 = vmatprep.subr.bf16.mxu1 %v1106_v50 }
 0x12a   :  { %1076 = vmatpush3.bf16.msra.mxu1 %v1075_v3 }
 0x12b   :  { %1077 = vmatprep.subr.bf16.mxu1 %v1106_v50  ;;  %v718_v50 = vand.u32 2147483648, %v1521_v61 }
 0x12e   :  { %1079 = vmatpush3.bf16.msra.mxu1 %v1078_v5 }
 0x1f4   :  { %v514_v7 = vpop.f32.mrb[4].mxu1 }
 0x1f5   :  { %v515_v8 = vadd.f32 %v752_v6, %v514_v7  ;;  %v918_v9 = vpop.f32.mrb[5].mxu1 }
 0x1f7   :  { %v518_v10 = vmax.f32 %v515_v8, 0.0 }
 0x1f9   :  { %936 = vmatmul.mubr.msk.f32.vlgmr.msra.gmra.mrb[6].mxu1 %vm444_vm2, %v518_v10  ;;  %1096 = vrsqrt.f32 %v518_v10  ;;  %vm722_vm3 = vcmp.eq.f32.partialorder %v518_v10, inf  ;;  %v725_v22 = vand.u32 2147483648, %v518_v10  ;;  %vm724_vm4 = vcmp.eq.f32.partialorder %v518_v10, 0.0 }
 0x1fa   :  { %1098 = vrsqrt.f32 %v1521_v61 }
 0x203   :  { %v1097_v19 = vpop.eup %1096 }
 0x204   :  { %v721_v20 = vmul.f32 %v1097_v19, %v518_v10  ;;  %v1099_v28 = vpop.eup %1098 }
 0x205   :  { %v714_v29 = vmul.f32 %v1099_v28, %v1521_v61 }
 0x206   :  { %v723_v23 = vsel %vm722_vm3, %v518_v10, %v721_v20 }
 0x207   :  { %v726_v24 = vsel %vm724_vm4, %v725_v22, %v723_v23  ;;  %v716_v30 = vsel %vm715_vm5, %v1521_v61, %v714_v29 }
 0x208   :  { %735 = vrot.lane.b32.xlu1 %v726_v24, %s1109_s27  ;;  %v719_v31 = vsel %vm717_vm6, %v718_v50, %v716_v30 }
 0x27a   :  { %v736_v32 = vpop.permute.xlu1 %735 }
 0x27b   :  { %v742_v33 = vsel %vm444_vm2, %v719_v31, %v736_v32 }
 0x27c   :  { %744 = vst [vmem:[%s1613_s9] sm:$0xff] %v742_v33 }
 0x2cc   :  { %v603_v35 = vpop.f32.mrb[6].mxu1 }
 0x2cd   :  { %v604_v36 = vadd.f32 %v754_v34, %v603_v35  ;;  %v937_v37 = vpop.f32.mrb[7].mxu1 }
 0x2cf   :  { %v607_v38 = vmax.f32 %v604_v36, 0.0 }
 0x2d1   :  { %955 = vmatmul.mubr.msk.f32.vlgmr.msra.gmra.mrb[4].mxu0 %vm444_vm2, %v607_v38  ;;  %vm729_vm8 = vcmp.eq.f32.partialorder %v607_v38, inf  ;;  %v732_v62 = vand.u32 2147483648, %v607_v38  ;;  %vm731_vm9 = vcmp.eq.f32.partialorder %v607_v38, 0.0 }
 0x3a4   :  { %v692_v42 = vpop.f32.mrb[4].mxu0 }
 0x3a5   :  { %v693_v43 = vadd.f32 %v756_v41, %v692_v42  ;;  %v956_v44 = vpop.f32.mrb[5].mxu0 }
 0x3a7   :  { %v699_v45 = vsel %vm698_vm7, %v693_v43, -inf }
 0x3a8   :  { %v700_v46 = vsel %vm444_vm2, %v699_v45, -inf }
 0x3a9   :  { %701 = vmax.xlane.f32.xlu0 %v700_v46 }
 0x436   :  { %v702_v47 = vpop.xlane.xlu0 %701 }
 0x437   :  { %v703_v48 = vsub.f32 %v699_v45, %v702_v47 }
 0x439   :  { %v704_v49 = vmul.f32 1.442695, %v703_v48 }
 0x43b   :  { %1100 = vpow2.f32 %v704_v49 }
 0x445   :  { %v1101_v51 = vpop.eup %1100 }
 0x446   :  { %v706_v52 = vsel %vm444_vm2, %v1101_v51, 0.0 }
 0x447   :  { %707 = vadd.xlane.f32.xlu0 %v706_v52 }
 0x4d4   :  { %v708_v53 = vpop.xlane.xlu0 %707 }
 0x4d5   :  { %1102 = vlog2.f32 %v708_v53 }
 0x4d6   :  { %1104 = vrsqrt.f32 %v607_v38 }
 0x4df   :  { %v1103_v54 = vpop.eup %1102 }
 0x4e0   :  { %v710_v55 = vmul.f32 0.6931472, %v1103_v54  ;;  %v1105_v58 = vpop.eup %1104 }
 0x4e1   :  { %v728_v59 = vmul.f32 %v1105_v58, %v607_v38 }
 0x4e2   :  { %v711_v56 = vsub.f32 %v703_v48, %v710_v55 }
 0x4e3   :  { %v730_v61 = vsel %vm729_vm8, %v607_v38, %v728_v59 }
 0x4e4   :  { %v712_v57 = vsel %vm698_vm7, %v711_v56, 0.0  ;;  %v733_v63 = vsel %vm731_vm9, %v732_v62, %v730_v61 }
 0x4e5   :  { %739 = vrot.lane.b32.xlu1 %v712_v57, %s1109_s27 }
 0x557   :  { %v740_v0 = vpop.permute.xlu1 %739 }
 0x558   :  { %v743_v1 = vsel %vm444_vm2, %v733_v63, %v740_v0 }
 0x559   :  { %745 = vst [vmem:[%s1613_s9 + $0x8] sm:$0xff] %v743_v1 }

</bundles_post_ra>
